<compile_context>
chip_gen: v7x
topology: tpu7x:2x2x1
jax: 0.10.0
libtpu: 0.0.40
codegen_flags: <defaults>
</compile_context>

<pallas_src>
import jax
import jax.numpy as jnp
from jax.experimental import pallas as pl
from jax.experimental.pallas import tpu as pltpu

BN_EPS = 1e-5


def _round_up(x, m):
    return ((x + m - 1) // m) * m


def yolo_kernel(x_ref, w_ref, b_ref, o_ref):
    """Fused 1x1-conv (channel matmul) + folded-BN bias + selective sigmoid.

    x_ref: (1, C, ts)          bf16  activations, spatial tile on lanes
    w_ref: (P*K5p, C)          bf16  folded conv+BN weights, heads stacked
    b_ref: (P*K5p, 1)          f32   folded bias
    o_ref: (P, 1, K5p, ts)     f32   per-head output, spatial on lanes
    """
    num_p, _, k5_pad, _ = o_ref.shape
    # MXU: (O, C) @ (C, ts) -> (O, ts), accumulate in f32.
    z = jnp.dot(w_ref[...], x_ref[0], preferred_element_type=jnp.float32)
    z = z + b_ref[...]                                   # (O, ts) + (O, 1)
    # Per-head channel order: [det, off_x, off_y, reg_w, reg_h, cls...]
    # rows 3..4 (regression) stay linear, everything else gets sigmoid.
    ch = jax.lax.broadcasted_iota(jnp.int32, (k5_pad, 1), 0)
    is_reg = jnp.logical_and(ch >= 3, ch < 5)
    for p in range(num_p):                               # small static unroll (P heads)
        zp = z[p * k5_pad:(p + 1) * k5_pad, :]
        o_ref[p, 0] = jnp.where(is_reg, zp, jax.nn.sigmoid(zp)).astype(o_ref.dtype)


def yolo_layer_forward(x_nchw, w_big, b_big, num_priors, num_class, k5_pad,
                       ts_max=512):
    N, C, H, W = x_nchw.shape
    hw = H * W
    k5 = num_class + 5
    o_pad = num_priors * k5_pad

    # Lane-dense spatial tile (multiple of 128); big enough to approach HBM roofline,
    # small enough that double-buffered blocks fit v7x's scoped VMEM.
    ts = min(ts_max, _round_up(hw, 128))
    hw_pad = _round_up(hw, ts)

    # NCHW -> (N, C, HW) is a free reshape (no extra HBM transpose pass).
    x3 = x_nchw.reshape(N, C, hw).astype(jnp.bfloat16)
    if hw_pad != hw:
        x3 = jnp.pad(x3, ((0, 0), (0, 0), (0, hw_pad - hw)))

    grid = (N, hw_pad // ts)

    flops = 2 * N * hw_pad * C * o_pad
    bytes_accessed = (x3.size * 2 + w_big.size * 2 + b_big.size * 4
                      + num_priors * N * k5_pad * hw_pad * 4)

    out_padded = pl.pallas_call(
        yolo_kernel,
        out_shape=jax.ShapeDtypeStruct((num_priors, N, k5_pad, hw_pad), jnp.float32),
        grid_spec=pltpu.PrefetchScalarGridSpec(
            num_scalar_prefetch=0,
            grid=grid,
            in_specs=[
                pl.BlockSpec((1, C, ts), lambda n, j: (n, 0, j)),   # activations
                pl.BlockSpec((o_pad, C), lambda n, j: (0, 0)),      # folded weights
                pl.BlockSpec((o_pad, 1), lambda n, j: (0, 0)),      # folded bias
            ],
            # Write straight into (P, N, K5p, HW): no output transpose in the wrapper.
            out_specs=pl.BlockSpec((num_priors, 1, k5_pad, ts),
                                   lambda n, j: (0, n, 0, j)),
        ),
        compiler_params=pltpu.CompilerParams(
            dimension_semantics=("parallel", "parallel")),
        cost_estimate=pl.CostEstimate(
            flops=flops,
            transcendentals=N * hw_pad * o_pad,
            bytes_accessed=bytes_accessed),
    )(x3, w_big, b_big)

    # Slice off channel / spatial padding (no-op when none) and restore (H, W).
    out = out_padded[:, :, :k5, :hw].reshape(num_priors, N, k5, H, W)
    return out


def make_head_params(key, in_channels, num_class):
    """Deterministic parameters for one YoloHead (conv weights, BN stats, regr bias)."""
    ks = jax.random.split(key, 16)
    p = {}
    # 1x1 conv weights stored as (out_ch, C)
    p["w_det"] = jax.random.normal(ks[0], (1, in_channels), jnp.float32) * 0.1
    p["w_off"] = jax.random.normal(ks[1], (2, in_channels), jnp.float32) * 0.1
    p["w_reg"] = jax.random.normal(ks[2], (2, in_channels), jnp.float32) * 0.1
    p["b_reg"] = jax.random.normal(ks[3], (2,), jnp.float32) * 0.1
    p["w_cls"] = jax.random.normal(ks[4], (num_class, in_channels), jnp.float32) * 0.1

    # eval-mode BatchNorm params: gamma, beta, running_mean, running_var
    def bn(k, n):
        a, b, c, d = jax.random.split(k, 4)
        return (jax.random.normal(a, (n,), jnp.float32) * 0.2 + 1.0,
                jax.random.normal(b, (n,), jnp.float32) * 0.1,
                jax.random.normal(c, (n,), jnp.float32) * 0.1,
                jnp.abs(jax.random.normal(d, (n,), jnp.float32)) * 0.5 + 0.5)
    p["bn_det"] = bn(ks[5], 1)
    p["bn_off"] = bn(ks[6], 2)
    p["bn_cls"] = bn(ks[7], num_class)
    return p


def fold_head(p, k5_pad):
    """Fold conv + eval BN into (W_eff: (K5p, C), b_eff: (K5p,)), rows padded to K5p."""
    def fold_bn(w_conv, bn):
        gamma, beta, mean, var = bn
        s = gamma / jnp.sqrt(var + BN_EPS)
        return w_conv * s[:, None], beta - s * mean

    wd, bd = fold_bn(p["w_det"], p["bn_det"])
    wo, bo = fold_bn(p["w_off"], p["bn_off"])
    wr, br = p["w_reg"], p["b_reg"]
    wc, bc = fold_bn(p["w_cls"], p["bn_cls"])

    w = jnp.concatenate([wd, wo, wr, wc], axis=0)   # (K+5, C)
    b = jnp.concatenate([bd, bo, br, bc], axis=0)   # (K+5,)
    k5 = w.shape[0]
    if k5_pad > k5:
        w = jnp.pad(w, ((0, k5_pad - k5), (0, 0)))
        b = jnp.pad(b, ((0, k5_pad - k5),))
    return w, b


def reference_forward(x_nchw, head_params_list, num_class):
    """Pure-JAX f32 reference replicating the PyTorch module (eval mode)."""
    outs = []
    for p in head_params_list:
        def conv(w):  # 1x1 conv: (out,C) applied to (N,C,H,W)
            return jnp.einsum("oc,nchw->nohw", w, x_nchw)

        def bn(y, params):
            gamma, beta, mean, var = params
            s = gamma / jnp.sqrt(var + BN_EPS)
            return y * s[None, :, None, None] + (beta - s * mean)[None, :, None, None]

        det = jax.nn.sigmoid(bn(conv(p["w_det"]), p["bn_det"]))
        off = jax.nn.sigmoid(bn(conv(p["w_off"]), p["bn_off"]))
        reg = conv(p["w_reg"]) + p["b_reg"][None, :, None, None]
        cls = jax.nn.sigmoid(bn(conv(p["w_cls"]), p["bn_cls"]))
        outs.append(jnp.concatenate([det, off, reg, cls], axis=1))
    return jnp.stack(outs, axis=0)  # (P, N, K+5, H, W)


if __name__ == "__main__":
    N, C, H, W = 2, 4, 16, 16
    K = 3            # num_class
    P = 2            # number of priors / heads

    key = jax.random.PRNGKey(0)
    kx, *khead = jax.random.split(key, 1 + P)

    x = jax.random.normal(kx, (N, C, H, W), jnp.float32)
    head_params = [make_head_params(k, C, K) for k in khead]

    # Fold all heads into one stacked weight/bias, per-head rows padded to sublane mult.
    k5_pad = _round_up(K + 5, 8)
    ws, bs = zip(*[fold_head(p, k5_pad) for p in head_params])
    w_big = jnp.concatenate(ws, axis=0).astype(jnp.bfloat16)          # (P*K5p, C)
    b_big = jnp.concatenate(bs, axis=0)[:, None].astype(jnp.float32)  # (P*K5p, 1)

    out = yolo_layer_forward(x, w_big, b_big, P, K, k5_pad)
    out = jax.block_until_ready(out)

    ref = reference_forward(x, head_params, K)
    assert out.shape == (P, N, K + 5, H, W), out.shape
    err = float(jnp.max(jnp.abs(out - ref)))
    # bf16 matmul operands (f32 accumulation) -> looser tolerance than pure f32.
    assert err < 2e-2, err

    print("KERNEL_OK")
</pallas_src>

<mosaic_0001>
module attributes {stable_mosaic.version = 11 : i64} {
  func.func @yolo_kernel(%arg0: i32, %arg1: i32, %arg2: memref<1x4x256xbf16, #tpu.memory_space<vmem>>, %arg3: memref<16x4xbf16, #tpu.memory_space<vmem>>, %arg4: memref<16x1xf32, #tpu.memory_space<vmem>>, %arg5: memref<2x1x8x256xf32, #tpu.memory_space<vmem>>) attributes {dimension_semantics = [#tpu.dimension_semantics<parallel>, #tpu.dimension_semantics<parallel>], iteration_bounds = array<i64: 2, 1>, scalar_prefetch = 0 : i64, scratch_operands = 0 : i64, tpu.core_type = #tpu.core_type<tc>, window_params = [{transform_indices = @transform_0, window_bounds = array<i64: 1, 4, 256>}, {pipeline_mode = #tpu.pipeline_mode<synchronous>, transform_indices = @transform_1, window_bounds = array<i64: 16, 4>}, {pipeline_mode = #tpu.pipeline_mode<synchronous>, transform_indices = @transform_2, window_bounds = array<i64: 16, 1>}, {transform_indices = @transform_3, window_bounds = array<i64: 2, 1, 8, 256>}]} {
    %c0 = arith.constant 0 : index
    %c0_0 = arith.constant 0 : index
    %0 = vector.load %arg3[%c0, %c0_0] : memref<16x4xbf16, #tpu.memory_space<vmem>>, vector<16x4xbf16>
    %c0_1 = arith.constant 0 : index
    %c0_2 = arith.constant 0 : index
    %c0_3 = arith.constant 0 : index
    %1 = vector.load %arg2[%c0_1, %c0_2, %c0_3] : memref<1x4x256xbf16, #tpu.memory_space<vmem>>, vector<1x4x256xbf16>
    %2 = vector.shape_cast %1 : vector<1x4x256xbf16> to vector<4x256xbf16>
    %cst = arith.constant dense<0.000000e+00> : vector<16x256xf32>
    %3 = tpu.matmul %0, %2, %cst {dimension_numbers = #tpu.dot_dimension_numbers<[1], [0], [0], [1], [0, 0, 1, 1], [], []>} : vector<16x4xbf16>, vector<4x256xbf16>, vector<16x256xf32> -> vector<16x256xf32>
    %c0_4 = arith.constant 0 : index
    %c0_5 = arith.constant 0 : index
    %4 = vector.load %arg4[%c0_4, %c0_5] : memref<16x1xf32, #tpu.memory_space<vmem>>, vector<16x1xf32>
    %5 = vector.broadcast %4 : vector<16x1xf32> to vector<16x256xf32>
    %6 = arith.addf %3, %5 : vector<16x256xf32>
    %7 = tpu.iota {dimensions = array<i32: 0>} : vector<8x1xi32>
    %c3_i32 = arith.constant 3 : i32
    %8 = vector.broadcast %c3_i32 : i32 to vector<8x1xi32>
    %9 = arith.cmpi sge, %7, %8 : vector<8x1xi32>
    %c5_i32 = arith.constant 5 : i32
    %10 = vector.broadcast %c5_i32 : i32 to vector<8x1xi32>
    %11 = arith.cmpi slt, %7, %10 : vector<8x1xi32>
    %12 = arith.andi %9, %11 : vector<8x1xi1>
    %13 = vector.extract_strided_slice %6 {offsets = [0, 0], sizes = [8, 256], strides = [1, 1]} : vector<16x256xf32> to vector<8x256xf32>
    %14 = arith.negf %13 : vector<8x256xf32>
    %15 = math.exp %14 : vector<8x256xf32>
    %cst_6 = arith.constant 1.000000e+00 : f32
    %16 = vector.broadcast %cst_6 : f32 to vector<8x256xf32>
    %17 = arith.addf %16, %15 : vector<8x256xf32>
    %18 = arith.divf %16, %17 : vector<8x256xf32>
    %19 = vector.shape_cast %12 : vector<8x1xi1> to vector<8x1xi1>
    %20 = vector.broadcast %19 : vector<8x1xi1> to vector<8x256xi1>
    %21 = arith.select %20, %13, %18 : vector<8x256xi1>, vector<8x256xf32>
    %c0_7 = arith.constant 0 : index
    %c0_8 = arith.constant 0 : index
    %c0_9 = arith.constant 0 : index
    %c0_10 = arith.constant 0 : index
    %22 = vector.load %arg5[%c0_7, %c0_8, %c0_9, %c0_10] : memref<2x1x8x256xf32, #tpu.memory_space<vmem>>, vector<1x1x8x256xf32>
    %23 = vector.shape_cast %22 : vector<1x1x8x256xf32> to vector<8x256xf32>
    %24 = vector.shape_cast %21 : vector<8x256xf32> to vector<1x1x8x256xf32>
    tpu.vector_store %arg5[%c0_7, %c0_8, %c0_9, %c0_10], %24 {strides = array<i32>} : memref<2x1x8x256xf32, #tpu.memory_space<vmem>>, vector<1x1x8x256xf32>,
    %25 = vector.extract_strided_slice %6 {offsets = [8, 0], sizes = [8, 256], strides = [1, 1]} : vector<16x256xf32> to vector<8x256xf32>
    %26 = arith.negf %25 : vector<8x256xf32>
    %27 = math.exp %26 : vector<8x256xf32>
    %cst_11 = arith.constant 1.000000e+00 : f32
    %28 = vector.broadcast %cst_11 : f32 to vector<8x256xf32>
    %29 = arith.addf %28, %27 : vector<8x256xf32>
    %30 = arith.divf %28, %29 : vector<8x256xf32>
    %31 = vector.shape_cast %12 : vector<8x1xi1> to vector<8x1xi1>
    %32 = vector.broadcast %31 : vector<8x1xi1> to vector<8x256xi1>
    %33 = arith.select %32, %25, %30 : vector<8x256xi1>, vector<8x256xf32>
    %c1 = arith.constant 1 : index
    %c0_12 = arith.constant 0 : index
    %c0_13 = arith.constant 0 : index
    %c0_14 = arith.constant 0 : index
    %34 = vector.load %arg5[%c1, %c0_12, %c0_13, %c0_14] : memref<2x1x8x256xf32, #tpu.memory_space<vmem>>, vector<1x1x8x256xf32>
    %35 = vector.shape_cast %34 : vector<1x1x8x256xf32> to vector<8x256xf32>
    %36 = vector.shape_cast %33 : vector<8x256xf32> to vector<1x1x8x256xf32>
    tpu.vector_store %arg5[%c1, %c0_12, %c0_13, %c0_14], %36 {strides = array<i32>} : memref<2x1x8x256xf32, #tpu.memory_space<vmem>>, vector<1x1x8x256xf32>,
    return
  }
  func.func @transform_0(%arg0: i32, %arg1: i32) -> (i32, i32, i32) {
    %c0_i32 = arith.constant 0 : i32
    %c0_i32_0 = arith.constant 0 : i32
    return %arg0, %c0_i32, %arg1 : i32, i32, i32
  }
  func.func @transform_1(%arg0: i32, %arg1: i32) -> (i32, i32) {
    %c0_i32 = arith.constant 0 : i32
    %c0_i32_0 = arith.constant 0 : i32
    %c0_i32_1 = arith.constant 0 : i32
    return %c0_i32, %c0_i32_0 : i32, i32
  }
  func.func @transform_2(%arg0: i32, %arg1: i32) -> (i32, i32) {
    %c0_i32 = arith.constant 0 : i32
    %c0_i32_0 = arith.constant 0 : i32
    %c0_i32_1 = arith.constant 0 : i32
    return %c0_i32, %c0_i32_0 : i32, i32
  }
  func.func @transform_3(%arg0: i32, %arg1: i32) -> (i32, i32, i32, i32) {
    %c0_i32 = arith.constant 0 : i32
    %c0_i32_0 = arith.constant 0 : i32
    %c0_i32_1 = arith.constant 0 : i32
    return %c0_i32, %arg0, %c0_i32_0, %arg1 : i32, i32, i32, i32
  }
}

</mosaic_0001>

<bundles_post_ra>
// kernel: tpu_custom_call.1
= control target key start
LH: loop header
LB: loop body
LE: loop exit
PB: predicated region body
PF: predicated region fallthrough
CT: control target
= control target key end

     0   :  { %8 = vsyncpa [#allocation3], 0  ;;  %s762_s0 = inlined_call_operand.vmem [shape: bf16[2,4,256], index: 0, kind: input, shape index: {}]   ;;  %s763_s1 = inlined_call_operand.vmem [shape: bf16[16,4], index: 1, kind: input, shape index: {}]   ;;  %s764_s2 = inlined_call_operand.vmem [shape: f32[16,1], index: 2, kind: input, shape index: {}]   ;;  %s765_s3 = inlined_call_operand.hbm [shape: f32[2,2,8,256], index: 3, kind: output, shape index: {}]  }
   0x1   :  { %10 = vsyncpa [#allocation3 + $0x1], 0  ;;  %s626_s12 = smov 0   ;;  %s628_s13 = smov 0  }
   0x2   :  { %s630_s14 = smov 0   ;;  %s632_s15 = smov 0  }
   0x3   :  { %s634_s16 = smov 0   ;;  %s636_s17 = smov 0  }
   0x4 LB: > { %s419_s18 = sadd.s32 4294967295, %s599_s17   ;;  %s420_s19 = sadd.s32 4294967294, %s599_s17   ;;  %s599_s17 = sphi %s636_s17, %s16_s17   ;;  %s595_s16 = sphi %s634_s16, %s774_s16   ;;  %s591_s15 = sphi %s632_s15, %s773_s15   ;;  %s587_s14 = sphi %s630_s14, %s772_s14   ;;  %s583_s13 = sphi %s628_s13, %s771_s13   ;;  %s579_s12 = sphi %s626_s12, %s770_s12  }
   0x5   : > { %s28_s20 = sadd.s32 1, %s595_s16  ;;  %s107_s21 = sadd.s32 1, %s587_s14 }
   0x6   : > { %p30_p0 = scmp.ge.s32.totalorder %s28_s20, 2  ;;  %p117_p1 = scmp.ne.s32.totalorder %s587_s14, %s583_s13 }
   0x7   : > { %p118_p2 = scmp.eq.s32.totalorder %s419_s18, 1  ;;  %p123_p3 = scmp.ne.s32.totalorder %s583_s13, %s579_s12 }
   0x8   : > { %s776_s20 = smov (%p30_p0, %s28_s20), 0  ;;  %p124_p5 = scmp.eq.s32.totalorder %s420_s19, 1 }
   0x9   : > { %p666_p4 = por %p118_p2, %p117_p1  ;;  %s102_s23 = ssub.s32 %s595_s16, %s776_s20 }
   0xa   : > { %p423_p6 = scmp.ge.s32.totalorder %s599_s17, 1  ;;  %p105_p7 = scmp.eq.s32.totalorder %s102_s23, 0 }
   0xb   : > { %p673_p8 = por %p124_p5, %p123_p3  ;;  %p161_p9 = scmp.lt.s32.totalorder %s599_s17, 3 }
   0xc   : > { %s679_s25 = scalar_select %p105_p7, %s587_s14, %s107_s21  }
   0xd   : > { %p162_p10 = pnand %p423_p6, %p161_p9 }
   0xe   : > { %p190_p11 = scmp.lt.s32.totalorder (!%p162_p10), %s591_s15, 1  ;;  %v601_v0 = vmov (!%p162_p10), 0   ;;  %v204_v1 = vld [vmem:[%s764_s2] sm:$0xff] (!%p162_p10)  ;;  %v205_v2 = vld [vmem:[%s764_s2 + $0x8] sm:$0xff] (!%p162_p10)  ;;  %vm234_vm0 = vcmask (!%p162_p10), 1041408   ;;  %vm230_vm1 = vcmask (!%p162_p10), 31744   ;;  %v284_v22 = vlaneseq (!%p162_p10) }
   0xf   : > { %165 = sbr.rel (%p162_p10) target bundleno = 293 (0x125), region = 32  ;;  %273 = vmatprep.mubr.bf16.mxu0 (!%p162_p10), %v601_v0  ;;  %503 = vset.pattern.permute.xlu0 (!%p162_p10), %v601_v0  ;;  %v504_v6 = vld [vmem:[%s763_s1] sm:$0xff] (!%p162_p10)   ;;  %s186_s10 = sand.u32 (!%p162_p10), 1, %s583_s13  }
  0x10   : > { %208 = vperm.xlu0 (!%p162_p10), %503, %v204_v1   ;;  %v285_v29 = vshrl.u32 (!%p162_p10), %v284_v22, 7  ;;  %s424_s11 = sshll.u32 (!%p162_p10), %s186_s10, 5  ;;  %s443_s21 = sshll.u32 (!%p162_p10), %s591_s15, 8 }
  0x11   : > { %s188_s18 = scalar_lea.vmem (!%p162_p10), [#allocation2], %s424_s11  ;;  %s710_s27 = scalar_lea.hbm (!%p162_p10), %s765_s3, %s443_s21 }
  0x12   : > { %vm286_vm2 = vcmp.ge.s32.totalorder (!%p162_p10), %v285_v29, 3  ;;  %vm287_vm3 = vcmp.lt.s32.totalorder (!%p162_p10), %v285_v29, 5  ;;  %s340_s19 = sshll.u32 (!%p162_p10), %s188_s18, 4  ;;  %s602_s29 = smov (!%p162_p10), [#allocation2]   ;;  %s703_s19 = int_to_ptr.vmem [resolvable:$true] %s340_s19 }
  0x13   : > { %vm696_vm4 = vmand (!%p162_p10), %vm286_vm2, %vm287_vm3  ;;  %s525_s30 = sshll.u32 (!%p162_p10), %s602_s29, 4  ;;  %s526_s30 = int_to_ptr.vmem [resolvable:$false] %s525_s30 }
  0x14   : > { %213 = vperm.xlu0 (!%p162_p10), %503, %v205_v2   ;;  %p528_p1 = scmp.lt.s32.totalorder (!%p162_p10), %s703_s19, %s526_s30 }
  0x16   : > { %s191_s28 = scalar_select %p190_p11, %s591_s15, 1 }
  0x17   : > { %s716_s15 = scalar_lea.sflag [#allocation3], %s186_s10 }
  0x18   : > { %s442_s4 = sshll.u32 %s191_s28, 2  ;;  %s521_s28 = scalar_lea.vmem %s703_s19, 512 }
  0x19   : > { %s197_s7 = scalar_lea.vmem %s762_s0, %s442_s4  ;;  %p522_p12 = scmp.ne.s32.totalorder %s703_s19, %s521_s28 }
  0x1a   : > { %v428_v3 = vld.sshfl [vmem:[%s197_s7] sm:$0x33 pattern:$0x76325410]  ;;  %s527_s4 = scalar_lea.vmem %s526_s30, 1024 }
  0x1b   : > { %v229_v4 = vcombine.high %v428_v3, %v428_v3  ;;  %v236_v5 = vsel %vm234_vm0, %v428_v3, 0  ;;  %p523_p13 = pnand %p522_p12, %p666_p4  ;;  %p529_p2 = scmp.lt.s32.totalorder %s527_s4, %s521_s28 }
  0x1d   : > { %429 = vmatprep.subr.msk.bf16.mxu0 %vm234_vm0, %v229_v4  ;;  %p524_p0 = pneg %p523_p13  ;;  %p530_p3 = por %p529_p2, %p528_p1 }
  0x1e   : > { %242 = vmatpush1.bf16.msra.mxu0 %v236_v5 }
  0x1f   : > { %p531_p5 = pnand %p530_p3, %p524_p0 }
  0x21   : > { %430 = vmatmul.mubr.msk.bf16.vlgmr.msra.gmra.mrb[0].mxu0 %vm230_vm1, %v504_v6 }
  0x8f   : > { %v209_v7 = vpop.permute.xlu0 %208 }
  0x93   : > { %v214_v11 = vpop.permute.xlu0 %213 }
  0xf4   : > { %v275_v8 = vpop.f32.mrb[0].mxu0 }
  0xf5   : > { %v276_v9 = vadd.f32 %v275_v8, %v209_v7  ;;  %v277_v10 = vpop.f32.mrb[1].mxu0 }
  0xf6   : > { %v278_v12 = vadd.f32 %v277_v10, %v209_v7  ;;  %v279_v13 = vpop.f32.mrb[2].mxu0 }
  0xf7   : > { %v431_v14 = vmul.f32 -1.442695, %v276_v9  ;;  %v280_v15 = vadd.f32 %v279_v13, %v214_v11  ;;  %v281_v16 = vpop.f32.mrb[3].mxu0 }
  0xf8   : > { %v432_v17 = vmul.f32 -1.442695, %v278_v12  ;;  %v282_v18 = vadd.f32 %v281_v16, %v214_v11 }
  0xf9   : > { %505 = vpow2.f32 %v431_v14  ;;  %v433_v19 = vmul.f32 -1.442695, %v280_v15 }
  0xfa   : > { %507 = vpow2.f32 %v432_v17  ;;  %v434_v20 = vmul.f32 -1.442695, %v282_v18 }
  0xfb   : > { %509 = vpow2.f32 %v433_v19 }
  0xfc   : > { %511 = vpow2.f32 %v434_v20 }
 0x103   : > { %v506_v21 = vpop.eup %505 }
 0x104   : > { %v508_v23 = vpop.eup %507  ;;  %v295_v24 = vadd.f32 1.0, %v506_v21 }
 0x105   : > { %v510_v25 = vpop.eup %509  ;;  %v296_v26 = vadd.f32 1.0, %v508_v23 }
 0x106   : > { %v512_v27 = vpop.eup %511  ;;  %513 = vrcp.f32 %v295_v24  ;;  %v313_v28 = vadd.f32 1.0, %v510_v25 }
 0x107   : > { %515 = vrcp.f32 %v296_v26  ;;  %v314_v30 = vadd.f32 1.0, %v512_v27 }
 0x108   : > { %517 = vrcp.f32 %v313_v28 }
 0x109   : > { %519 = vrcp.f32 %v314_v30 }
 0x110   : > { %v514_v32 = vpop.eup %513 }
 0x111   : > { %v516_v33 = vpop.eup %515  ;;  %v303_v34 = vsel %vm696_vm4, %v276_v9, %v514_v32 }
 0x112   : > { %v518_v35 = vpop.eup %517  ;;  %305 = vst [vmem:[%s188_s18] sm:$0xff] %v303_v34  ;;  %v304_v36 = vsel %vm696_vm4, %v278_v12, %v516_v33 }
 0x113   : > { %v520_v37 = vpop.eup %519  ;;  %306 = vst [vmem:[%s188_s18 + $0x8] sm:$0xff] %v304_v36  ;;  %v319_v38 = vsel %vm696_vm4, %v280_v15, %v518_v35 }
 0x114   : > { %435 = vst [vmem:[%s188_s18 + $0x10] sm:$0xff] %v319_v38  ;;  %v320_v39 = vsel %vm696_vm4, %v282_v18, %v520_v37 }
 0x115   : > { %436 = vst [vmem:[%s188_s18 + $0x18] sm:$0xff] %v320_v39 }
 0x116   : > { %534 = shalt.err (!%p531_p5)
}
 0x117   : > { %s535_s5 = scalar_lea.hbm %s710_s27, 512  ;;  %s539_s8 = scalar_lea.hbm %s765_s3, 1024 }
 0x118   : > { %p536_p6 = scmp.ne.s32.totalorder %s710_s27, %s535_s5  ;;  %p540_p10 = scmp.lt.u32.totalorder %s710_s27, %s765_s3 }
 0x119   : > { %p541_p11 = scmp.lt.u32.totalorder %s539_s8, %s535_s5  ;;  %p543_p13 = scmp.lt.u32.totalorder %s535_s5, %s710_s27 }
 0x11a   : > { %p537_p7 = pnand %p536_p6, %p666_p4 }
 0x11b   : > { %p542_p12 = por %p541_p11, %p540_p10 }
 0x11c   : > { %p538_p9 = pneg %p537_p7 }
 0x11d   : > { %p544_p0 = por %p543_p13, %p542_p12 }
 0x11f   : > { %p545_p1 = pnand %p544_p0, %p538_p9 }
 0x121   : > { %548 = shalt.err (!%p545_p1)
}
 0x122   : > { %s603_s11 = smov 256   ;;  %s604_s18 = smov 512  }
 0x123   : > { %s605_s21 = smov 16  }
 0x124   : > { %444 = dma.vmem_to_hbm [thread:$0]  (%p666_p4), %s703_s19, 512, %s710_s27, %s716_s15, %s603_s11, %s604_s18, %s605_s21  }
 0x125 PF: > { %p450_p2 = scmp.ge.s32.totalorder %s599_s17, 2  ;;  %s355_s23 = sand.u32 1, %s579_s12  }
 0x126   : > { %s356_s26 = scalar_lea.sflag [#allocation3], %s355_s23 }
 0x127   : > { %p447_p3 = pnand %p450_p2, %p673_p8 }
 0x129   : > { %574 = dma.done.wait (!%p447_p3), %s356_s26, 512  }
 0x12a   : > { %576 = vsyncadd (!%p447_p3), %s356_s26, 4294966784  ;;  %s16_s17 = sadd.s32 1, %s599_s17   ;;  %s770_s12 = smov %s583_s13 }
 0x12b   : > { %p13_p5 = scmp.ge.s32.totalorder %s16_s17, 4   ;;  %s771_s13 = smov %s587_s14 }
 0x12c   : > { %s772_s14 = smov %s679_s25  ;;  %s773_s15 = smov %s595_s16 }
 0x12d   : > { %s774_s16 = smov %s776_s20  ;;  %15 = sbr.rel (!%p13_p5) target bundleno = 4 (0x4), region = 68 }
 0x134   :  { %361 = vsyncpa [#allocation3], 1 }
 0x135   :  { %363 = vsyncpa [#allocation3 + $0x1], 1 }

</bundles_post_ra>
